<compile_context>
chip_gen: v7x
topology: tpu7x:2x2x1
jax: 0.10.0
libtpu: 0.0.40
codegen_flags: <defaults>
</compile_context>

<pallas_src>
import jax
import jax.numpy as jnp
from jax import lax
from jax.experimental import pallas as pl
from jax.experimental.pallas import tpu as pltpu


def _fp_kernel(p1_ref, p2_ref, sq2_ref, f1_ref, f2_ref,
               w1a_ref, w1b_ref, s1_ref, b1_ref,
               w2_ref, s2_ref, b2_ref,
               out_ref):
    # One (batch, N1-tile) per grid step.
    p1 = p1_ref[0]           # (TN1, 3)  query ("unknown") coordinates, f32
    p2 = p2_ref[0]           # (N2, 3)   support ("known") coordinates, f32
    sq2 = sq2_ref[0]         # (1, N2)   ||p2||^2 per support point, f32
    f1 = f1_ref[0]           # (C1, TN1) skip features (NCW tile)
    f2 = f2_ref[0]           # (C2, N2)  coarse features (NCW)
    tn1 = p1.shape[0]
    n2 = p2.shape[0]

    contract_last = (((1,), (1,)), ((), ()))

    # ---- pairwise partial squared distance (TN1, N2) on the MXU -------------
    cross = lax.dot_general(p1, p2, contract_last,
                            preferred_element_type=jnp.float32)      # <p1,p2>
    # ||p1||^2 is constant per row -> does not affect the per-row argmin.
    work = sq2 - 2.0 * cross                                          # (TN1,N2)
    sq1 = jnp.sum(p1 * p1, axis=-1, keepdims=True)                    # (TN1,1)

    # ---- three-NN inverse-distance interpolation weights ---------------------
    # Select the 3 smallest distances per query and build a dense (TN1, N2)
    # weight matrix so the gather becomes a matmul.  sqrt / reciprocal are only
    # applied to the 3 selected minima per point.
    col = lax.broadcasted_iota(jnp.int32, (tn1, n2), 1)
    w_acc = jnp.zeros((tn1, n2), jnp.float32)
    recip_sum = jnp.zeros((tn1, 1), jnp.float32)
    for _ in range(3):
        min_p = jnp.min(work, axis=-1, keepdims=True)                 # (TN1,1)
        # first-occurrence argmin along the lane (N2) axis
        idx = jnp.min(jnp.where(work == min_p, col, n2), axis=-1,
                      keepdims=True)                                  # (TN1,1)
        onehot = col == idx                                           # (TN1,N2)
        d = jnp.sqrt(jnp.maximum(min_p + sq1, 0.0))                   # true dist
        recip = pl.reciprocal(d + 1e-8, approx=True)                  # (TN1,1)
        w_acc = w_acc + jnp.where(onehot, recip, 0.0)
        recip_sum = recip_sum + recip
        work = jnp.where(onehot, jnp.float32(1e30), work)

    inv_norm = pl.reciprocal(recip_sum, approx=True)                  # (TN1,1)
    wmat = (w_acc * inv_norm).astype(jnp.bfloat16)                    # (TN1,N2)

    # interp_T (C2, TN1) = f2 @ wmat^T  (bf16 operands, f32 accumulation)
    interp_t = lax.dot_general(f2.astype(jnp.bfloat16), wmat, contract_last,
                               preferred_element_type=jnp.float32)    # (C2,TN1)

    # ---- two fused Conv1d(k=1) + BN(eval, folded) + ReLU, channels-major -----
    # concat is folded away: h = W1a @ f1 + W1b @ interp
    h = jnp.dot(w1a_ref[...], f1.astype(jnp.bfloat16),
                preferred_element_type=jnp.float32)                   # (H1,TN1)
    h = h + jnp.dot(w1b_ref[...], interp_t.astype(jnp.bfloat16),
                    preferred_element_type=jnp.float32)
    h = jnp.maximum(h * s1_ref[...] + b1_ref[...], 0.0)

    h = jnp.dot(w2_ref[...], h.astype(jnp.bfloat16),
                preferred_element_type=jnp.float32)                   # (H2,TN1)
    h = jnp.maximum(h * s2_ref[...] + b2_ref[...], 0.0)

    out_ref[0] = h.astype(out_ref.dtype)


def feature_propagation(p1, p2, f1, f2, params, tile_n1=None):
    """p1:(B,N1,3) p2:(B,N2,3) f1:(B,C1,N1) f2:(B,C2,N2) -> (B,Cout,N1) (NCW)."""
    B, N1, _ = p1.shape
    _, N2, _ = p2.shape
    C1 = f1.shape[1]
    C2 = f2.shape[1]
    w1, s1, b1, w2, s2, b2 = params
    H1 = w1.shape[0]
    H2 = w2.shape[0]

    if tile_n1 is None:
        # largest divisor tile that keeps (TN1, N2) intermediates small; use
        # tile_n1=256 explicitly on v7x (64 MiB physical VMEM) for huge N2.
        tile_n1 = next((t for t in (512, 256, 128) if N1 % t == 0), N1)
    assert N1 % tile_n1 == 0, (N1, tile_n1)
    n_tiles = N1 // tile_n1

    p1 = p1.astype(jnp.float32)
    p2 = p2.astype(jnp.float32)
    f1 = f1.astype(jnp.float32)
    f2 = f2.astype(jnp.float32)
    sq2 = jnp.sum(p2 * p2, axis=-1)[:, None, :]             # (B,1,N2)  ||p2||^2

    # split W1 so the channel concat disappears; weights in PyTorch (cout,cin)
    # orientation work directly for channels-major matmuls.
    w1a = w1[:, :C1].astype(jnp.bfloat16)                   # (H1, C1)
    w1b = w1[:, C1:].astype(jnp.bfloat16)                   # (H1, C2)
    w2b = w2.astype(jnp.bfloat16)                           # (H2, H1)

    out = pl.pallas_call(
        _fp_kernel,
        out_shape=jax.ShapeDtypeStruct((B, H2, N1), jnp.float32),
        grid=(B, n_tiles),
        in_specs=[
            pl.BlockSpec((1, tile_n1, 3), lambda b, t: (b, t, 0)),    # p1 tile
            pl.BlockSpec((1, N2, 3),      lambda b, t: (b, 0, 0)),    # p2
            pl.BlockSpec((1, 1, N2),      lambda b, t: (b, 0, 0)),    # ||p2||^2
            pl.BlockSpec((1, C1, tile_n1), lambda b, t: (b, 0, t)),   # f1 (NCW)
            pl.BlockSpec((1, C2, N2),     lambda b, t: (b, 0, 0)),    # f2 (NCW)
            pl.BlockSpec((H1, C1), lambda b, t: (0, 0)),              # W1a
            pl.BlockSpec((H1, C2), lambda b, t: (0, 0)),              # W1b
            pl.BlockSpec((H1, 1),  lambda b, t: (0, 0)),              # s1
            pl.BlockSpec((H1, 1),  lambda b, t: (0, 0)),              # b1
            pl.BlockSpec((H2, H1), lambda b, t: (0, 0)),              # W2
            pl.BlockSpec((H2, 1),  lambda b, t: (0, 0)),              # s2
            pl.BlockSpec((H2, 1),  lambda b, t: (0, 0)),              # b2
        ],
        out_specs=pl.BlockSpec((1, H2, tile_n1), lambda b, t: (b, 0, t)),
        compiler_params=pltpu.CompilerParams(
            dimension_semantics=("parallel", "parallel"),
            vmem_limit_bytes=48 * 1024 * 1024),
    )(p1, p2, sq2, f1, f2, w1a, w1b, s1, b1, w2b, s2, b2)

    return out   # already in the PyTorch NCW layout (B, Cout, N1)


def init_params(key, mlp):
    """Deterministic parameters for convs = [Conv1d(k=1)+BN1d+ReLU] blocks.

    Conv1d(cin, cout, 1): weight (cout, cin, 1), bias (cout,).
    BatchNorm1d(cout) in eval mode is folded into per-channel scale/shift.
    Returns, per block: W (cout, cin), scale (cout, 1), bias_eff (cout, 1).
    """
    eps = 1e-5
    params = []
    keys = jax.random.split(key, len(mlp) - 1)
    for i in range(len(mlp) - 1):
        cin, cout = mlp[i], mlp[i + 1]
        kw, kb, kg, kbe = jax.random.split(keys[i], 4)
        bound = 1.0 / (cin ** 0.5)
        w_pt = jax.random.uniform(kw, (cout, cin), jnp.float32, -bound, bound)
        b_pt = jax.random.uniform(kb, (cout,), jnp.float32, -bound, bound)
        gamma = 1.0 + 0.1 * jax.random.normal(kg, (cout,), jnp.float32)
        beta = 0.1 * jax.random.normal(kbe, (cout,), jnp.float32)
        run_mean = jnp.zeros((cout,), jnp.float32)
        run_var = jnp.ones((cout,), jnp.float32)
        scale = gamma / jnp.sqrt(run_var + eps)
        shift = beta - run_mean * scale
        params.append(w_pt)                                    # (cout, cin)
        params.append(scale.reshape(cout, 1))                  # (cout, 1)
        params.append((b_pt * scale + shift).reshape(cout, 1)) # (cout, 1)
    return params


if __name__ == "__main__":
    key = jax.random.PRNGKey(0)
    k_p1, k_p2, k_f1, k_f2, k_par = jax.random.split(key, 5)

    B, N1, N2 = 2, 16, 8          # N1 fine points, N2 coarse points
    C1, C2 = 4, 8                 # skip / coarse feature channels
    mlp = [C1 + C2, 16, 16]       # FeaturePropogation(mlp, upsample=True)

    p1 = jax.random.uniform(k_p1, (B, N1, 3), jnp.float32)
    p2 = jax.random.uniform(k_p2, (B, N2, 3), jnp.float32)
    f1 = jax.random.normal(k_f1, (B, C1, N1), jnp.float32)
    f2 = jax.random.normal(k_f2, (B, C2, N2), jnp.float32)

    params = init_params(k_par, mlp)

    out = feature_propagation(p1, p2, f1, f2, params)
    out = jax.block_until_ready(out)

    assert out.shape == (B, mlp[-1], N1), out.shape
    assert bool(jnp.all(jnp.isfinite(out)))
    assert bool(jnp.all(out >= 0.0))      # last op is ReLU

    print("KERNEL_OK")
</pallas_src>

<mosaic_0001>
module attributes {stable_mosaic.version = 11 : i64} {
  func.func @_fp_kernel(%arg0: i32, %arg1: i32, %arg2: memref<1x16x3xf32, #tpu.memory_space<vmem>>, %arg3: memref<1x8x3xf32, #tpu.memory_space<vmem>>, %arg4: memref<1x1x8xf32, #tpu.memory_space<vmem>>, %arg5: memref<1x4x16xf32, #tpu.memory_space<vmem>>, %arg6: memref<1x8x8xf32, #tpu.memory_space<vmem>>, %arg7: memref<16x4xbf16, #tpu.memory_space<vmem>>, %arg8: memref<16x8xbf16, #tpu.memory_space<vmem>>, %arg9: memref<16x1xf32, #tpu.memory_space<vmem>>, %arg10: memref<16x1xf32, #tpu.memory_space<vmem>>, %arg11: memref<16x16xbf16, #tpu.memory_space<vmem>>, %arg12: memref<16x1xf32, #tpu.memory_space<vmem>>, %arg13: memref<16x1xf32, #tpu.memory_space<vmem>>, %arg14: memref<1x16x16xf32, #tpu.memory_space<vmem>>) attributes {dimension_semantics = [#tpu.dimension_semantics<parallel>, #tpu.dimension_semantics<parallel>], iteration_bounds = array<i64: 2, 1>, scalar_prefetch = 0 : i64, scratch_operands = 0 : i64, tpu.core_type = #tpu.core_type<tc>, window_params = [{transform_indices = @transform_0, window_bounds = array<i64: 1, 16, 3>}, {transform_indices = @transform_1, window_bounds = array<i64: 1, 8, 3>}, {transform_indices = @transform_2, window_bounds = array<i64: 1, 1, 8>}, {transform_indices = @transform_3, window_bounds = array<i64: 1, 4, 16>}, {transform_indices = @transform_4, window_bounds = array<i64: 1, 8, 8>}, {pipeline_mode = #tpu.pipeline_mode<synchronous>, transform_indices = @transform_5, window_bounds = array<i64: 16, 4>}, {pipeline_mode = #tpu.pipeline_mode<synchronous>, transform_indices = @transform_6, window_bounds = array<i64: 16, 8>}, {pipeline_mode = #tpu.pipeline_mode<synchronous>, transform_indices = @transform_7, window_bounds = array<i64: 16, 1>}, {pipeline_mode = #tpu.pipeline_mode<synchronous>, transform_indices = @transform_8, window_bounds = array<i64: 16, 1>}, {pipeline_mode = #tpu.pipeline_mode<synchronous>, transform_indices = @transform_9, window_bounds = array<i64: 16, 16>}, {pipeline_mode = #tpu.pipeline_mode<synchronous>, transform_indices = @transform_10, window_bounds = array<i64: 16, 1>}, {pipeline_mode = #tpu.pipeline_mode<synchronous>, transform_indices = @transform_11, window_bounds = array<i64: 16, 1>}, {transform_indices = @transform_12, window_bounds = array<i64: 1, 16, 16>}]} {
    %c0 = arith.constant 0 : index
    %c0_0 = arith.constant 0 : index
    %c0_1 = arith.constant 0 : index
    %0 = vector.load %arg2[%c0, %c0_0, %c0_1] : memref<1x16x3xf32, #tpu.memory_space<vmem>>, vector<1x16x3xf32>
    %1 = vector.shape_cast %0 : vector<1x16x3xf32> to vector<16x3xf32>
    %c0_2 = arith.constant 0 : index
    %c0_3 = arith.constant 0 : index
    %c0_4 = arith.constant 0 : index
    %2 = vector.load %arg3[%c0_2, %c0_3, %c0_4] : memref<1x8x3xf32, #tpu.memory_space<vmem>>, vector<1x8x3xf32>
    %3 = vector.shape_cast %2 : vector<1x8x3xf32> to vector<8x3xf32>
    %c0_5 = arith.constant 0 : index
    %c0_6 = arith.constant 0 : index
    %c0_7 = arith.constant 0 : index
    %4 = vector.load %arg4[%c0_5, %c0_6, %c0_7] : memref<1x1x8xf32, #tpu.memory_space<vmem>>, vector<1x1x8xf32>
    %5 = vector.shape_cast %4 : vector<1x1x8xf32> to vector<1x8xf32>
    %c0_8 = arith.constant 0 : index
    %c0_9 = arith.constant 0 : index
    %c0_10 = arith.constant 0 : index
    %6 = vector.load %arg5[%c0_8, %c0_9, %c0_10] : memref<1x4x16xf32, #tpu.memory_space<vmem>>, vector<1x4x16xf32>
    %7 = vector.shape_cast %6 : vector<1x4x16xf32> to vector<4x16xf32>
    %c0_11 = arith.constant 0 : index
    %c0_12 = arith.constant 0 : index
    %c0_13 = arith.constant 0 : index
    %8 = vector.load %arg6[%c0_11, %c0_12, %c0_13] : memref<1x8x8xf32, #tpu.memory_space<vmem>>, vector<1x8x8xf32>
    %9 = vector.shape_cast %8 : vector<1x8x8xf32> to vector<8x8xf32>
    %cst = arith.constant dense<0.000000e+00> : vector<16x8xf32>
    %10 = tpu.matmul %1, %3, %cst {dimension_numbers = #tpu.dot_dimension_numbers<[1], [1], [0], [0], [0, 0, 1, 0], [], []>} : vector<16x3xf32>, vector<8x3xf32>, vector<16x8xf32> -> vector<16x8xf32>
    %cst_14 = arith.constant 2.000000e+00 : f32
    %11 = vector.broadcast %cst_14 : f32 to vector<16x8xf32>
    %12 = arith.mulf %11, %10 : vector<16x8xf32>
    %13 = vector.broadcast %5 : vector<1x8xf32> to vector<16x8xf32>
    %14 = arith.subf %13, %12 : vector<16x8xf32>
    %15 = arith.mulf %1, %1 : vector<16x3xf32>
    %cst_15 = arith.constant dense<0.000000e+00> : vector<16xf32>
    %16 = vector.multi_reduction <add>, %15, %cst_15 [1] : vector<16x3xf32> to vector<16xf32>
    %17 = vector.shape_cast %16 : vector<16xf32> to vector<16x1xf32>
    %18 = tpu.iota {dimensions = array<i32: 1>} : vector<16x8xi32>
    %cst_16 = arith.constant 0.000000e+00 : f32
    %19 = vector.broadcast %cst_16 : f32 to vector<16x8xf32>
    %cst_17 = arith.constant 0.000000e+00 : f32
    %20 = vector.broadcast %cst_17 : f32 to vector<16x1xf32>
    %cst_18 = arith.constant dense<0x7F800000> : vector<16xf32>
    %21 = vector.multi_reduction <minimumf>, %14, %cst_18 [1] : vector<16x8xf32> to vector<16xf32>
    %22 = vector.shape_cast %21 : vector<16xf32> to vector<16x1xf32>
    %23 = vector.broadcast %22 : vector<16x1xf32> to vector<16x8xf32>
    %24 = arith.cmpf oeq, %14, %23 : vector<16x8xf32>
    %c8_i32 = arith.constant 8 : i32
    %25 = vector.broadcast %c8_i32 : i32 to vector<16x8xi32>
    %26 = arith.select %24, %18, %25 : vector<16x8xi1>, vector<16x8xi32>
    %cst_19 = arith.constant dense<2147483647> : vector<16xi32>
    %27 = vector.multi_reduction <minsi>, %26, %cst_19 [1] : vector<16x8xi32> to vector<16xi32>
    %28 = vector.shape_cast %27 : vector<16xi32> to vector<16x1xi32>
    %29 = vector.broadcast %28 : vector<16x1xi32> to vector<16x8xi32>
    %30 = arith.cmpi eq, %18, %29 : vector<16x8xi32>
    %31 = arith.addf %22, %17 : vector<16x1xf32>
    %cst_20 = arith.constant 0.000000e+00 : f32
    %32 = vector.broadcast %cst_20 : f32 to vector<16x1xf32>
    %33 = arith.maximumf %31, %32 : vector<16x1xf32>
    %34 = math.sqrt %33 : vector<16x1xf32>
    %cst_21 = arith.constant 9.99999993E-9 : f32
    %35 = vector.broadcast %cst_21 : f32 to vector<16x1xf32>
    %36 = arith.addf %34, %35 : vector<16x1xf32>
    %37 = tpu.reciprocal %36 {approx = true} : vector<16x1xf32> -> vector<16x1xf32>
    %cst_22 = arith.constant 0.000000e+00 : f32
    %38 = vector.shape_cast %37 : vector<16x1xf32> to vector<16x1xf32>
    %39 = vector.broadcast %38 : vector<16x1xf32> to vector<16x8xf32>
    %40 = vector.broadcast %cst_22 : f32 to vector<16x8xf32>
    %41 = arith.select %30, %39, %40 : vector<16x8xi1>, vector<16x8xf32>
    %42 = arith.addf %19, %41 : vector<16x8xf32>
    %43 = arith.addf %20, %37 : vector<16x1xf32>
    %cst_23 = arith.constant 1.000000e+30 : f32
    %44 = vector.broadcast %cst_23 : f32 to vector<16x8xf32>
    %45 = arith.select %30, %44, %14 : vector<16x8xi1>, vector<16x8xf32>
    %cst_24 = arith.constant dense<0x7F800000> : vector<16xf32>
    %46 = vector.multi_reduction <minimumf>, %45, %cst_24 [1] : vector<16x8xf32> to vector<16xf32>
    %47 = vector.shape_cast %46 : vector<16xf32> to vector<16x1xf32>
    %48 = vector.broadcast %47 : vector<16x1xf32> to vector<16x8xf32>
    %49 = arith.cmpf oeq, %45, %48 : vector<16x8xf32>
    %c8_i32_25 = arith.constant 8 : i32
    %50 = vector.broadcast %c8_i32_25 : i32 to vector<16x8xi32>
    %51 = arith.select %49, %18, %50 : vector<16x8xi1>, vector<16x8xi32>
    %cst_26 = arith.constant dense<2147483647> : vector<16xi32>
    %52 = vector.multi_reduction <minsi>, %51, %cst_26 [1] : vector<16x8xi32> to vector<16xi32>
    %53 = vector.shape_cast %52 : vector<16xi32> to vector<16x1xi32>
    %54 = vector.broadcast %53 : vector<16x1xi32> to vector<16x8xi32>
    %55 = arith.cmpi eq, %18, %54 : vector<16x8xi32>
    %56 = arith.addf %47, %17 : vector<16x1xf32>
    %cst_27 = arith.constant 0.000000e+00 : f32
    %57 = vector.broadcast %cst_27 : f32 to vector<16x1xf32>
    %58 = arith.maximumf %56, %57 : vector<16x1xf32>
    %59 = math.sqrt %58 : vector<16x1xf32>
    %cst_28 = arith.constant 9.99999993E-9 : f32
    %60 = vector.broadcast %cst_28 : f32 to vector<16x1xf32>
    %61 = arith.addf %59, %60 : vector<16x1xf32>
    %62 = tpu.reciprocal %61 {approx = true} : vector<16x1xf32> -> vector<16x1xf32>
    %cst_29 = arith.constant 0.000000e+00 : f32
    %63 = vector.shape_cast %62 : vector<16x1xf32> to vector<16x1xf32>
    %64 = vector.broadcast %63 : vector<16x1xf32> to vector<16x8xf32>
    %65 = vector.broadcast %cst_29 : f32 to vector<16x8xf32>
    %66 = arith.select %55, %64, %65 : vector<16x8xi1>, vector<16x8xf32>
    %67 = arith.addf %42, %66 : vector<16x8xf32>
    %68 = arith.addf %43, %62 : vector<16x1xf32>
    %cst_30 = arith.constant 1.000000e+30 : f32
    %69 = vector.broadcast %cst_30 : f32 to vector<16x8xf32>
    %70 = arith.select %55, %69, %45 : vector<16x8xi1>, vector<16x8xf32>
    %cst_31 = arith.constant dense<0x7F800000> : vector<16xf32>
    %71 = vector.multi_reduction <minimumf>, %70, %cst_31 [1] : vector<16x8xf32> to vector<16xf32>
    %72 = vector.shape_cast %71 : vector<16xf32> to vector<16x1xf32>
    %73 = vector.broadcast %72 : vector<16x1xf32> to vector<16x8xf32>
    %74 = arith.cmpf oeq, %70, %73 : vector<16x8xf32>
    %c8_i32_32 = arith.constant 8 : i32
    %75 = vector.broadcast %c8_i32_32 : i32 to vector<16x8xi32>
    %76 = arith.select %74, %18, %75 : vector<16x8xi1>, vector<16x8xi32>
    %cst_33 = arith.constant dense<2147483647> : vector<16xi32>
    %77 = vector.multi_reduction <minsi>, %76, %cst_33 [1] : vector<16x8xi32> to vector<16xi32>
    %78 = vector.shape_cast %77 : vector<16xi32> to vector<16x1xi32>
    %79 = vector.broadcast %78 : vector<16x1xi32> to vector<16x8xi32>
    %80 = arith.cmpi eq, %18, %79 : vector<16x8xi32>
    %81 = arith.addf %72, %17 : vector<16x1xf32>
    %cst_34 = arith.constant 0.000000e+00 : f32
    %82 = vector.broadcast %cst_34 : f32 to vector<16x1xf32>
    %83 = arith.maximumf %81, %82 : vector<16x1xf32>
    %84 = math.sqrt %83 : vector<16x1xf32>
    %cst_35 = arith.constant 9.99999993E-9 : f32
    %85 = vector.broadcast %cst_35 : f32 to vector<16x1xf32>
    %86 = arith.addf %84, %85 : vector<16x1xf32>
    %87 = tpu.reciprocal %86 {approx = true} : vector<16x1xf32> -> vector<16x1xf32>
    %cst_36 = arith.constant 0.000000e+00 : f32
    %88 = vector.shape_cast %87 : vector<16x1xf32> to vector<16x1xf32>
    %89 = vector.broadcast %88 : vector<16x1xf32> to vector<16x8xf32>
    %90 = vector.broadcast %cst_36 : f32 to vector<16x8xf32>
    %91 = arith.select %80, %89, %90 : vector<16x8xi1>, vector<16x8xf32>
    %92 = arith.addf %67, %91 : vector<16x8xf32>
    %93 = arith.addf %68, %87 : vector<16x1xf32>
    %94 = tpu.reciprocal %93 {approx = true} : vector<16x1xf32> -> vector<16x1xf32>
    %95 = vector.broadcast %94 : vector<16x1xf32> to vector<16x8xf32>
    %96 = arith.mulf %92, %95 : vector<16x8xf32>
    %97 = arith.truncf %96 : vector<16x8xf32> to vector<16x8xbf16>
    %98 = arith.truncf %9 : vector<8x8xf32> to vector<8x8xbf16>
    %cst_37 = arith.constant dense<0.000000e+00> : vector<8x16xf32>
    %99 = tpu.matmul %98, %97, %cst_37 {dimension_numbers = #tpu.dot_dimension_numbers<[1], [1], [0], [0], [0, 0, 1, 0], [], []>} : vector<8x8xbf16>, vector<16x8xbf16>, vector<8x16xf32> -> vector<8x16xf32>
    %c0_38 = arith.constant 0 : index
    %c0_39 = arith.constant 0 : index
    %100 = vector.load %arg7[%c0_38, %c0_39] : memref<16x4xbf16, #tpu.memory_space<vmem>>, vector<16x4xbf16>
    %101 = arith.truncf %7 : vector<4x16xf32> to vector<4x16xbf16>
    %cst_40 = arith.constant dense<0.000000e+00> : vector<16x16xf32>
    %102 = tpu.matmul %100, %101, %cst_40 {dimension_numbers = #tpu.dot_dimension_numbers<[1], [0], [0], [1], [0, 0, 1, 1], [], []>} : vector<16x4xbf16>, vector<4x16xbf16>, vector<16x16xf32> -> vector<16x16xf32>
    %c0_41 = arith.constant 0 : index
    %c0_42 = arith.constant 0 : index
    %103 = vector.load %arg8[%c0_41, %c0_42] : memref<16x8xbf16, #tpu.memory_space<vmem>>, vector<16x8xbf16>
    %104 = arith.truncf %99 : vector<8x16xf32> to vector<8x16xbf16>
    %cst_43 = arith.constant dense<0.000000e+00> : vector<16x16xf32>
    %105 = tpu.matmul %103, %104, %cst_43 {dimension_numbers = #tpu.dot_dimension_numbers<[1], [0], [0], [1], [0, 0, 1, 1], [], []>} : vector<16x8xbf16>, vector<8x16xbf16>, vector<16x16xf32> -> vector<16x16xf32>
    %106 = arith.addf %102, %105 : vector<16x16xf32>
    %c0_44 = arith.constant 0 : index
    %c0_45 = arith.constant 0 : index
    %107 = vector.load %arg9[%c0_44, %c0_45] : memref<16x1xf32, #tpu.memory_space<vmem>>, vector<16x1xf32>
    %108 = vector.broadcast %107 : vector<16x1xf32> to vector<16x16xf32>
    %109 = arith.mulf %106, %108 : vector<16x16xf32>
    %c0_46 = arith.constant 0 : index
    %c0_47 = arith.constant 0 : index
    %110 = vector.load %arg10[%c0_46, %c0_47] : memref<16x1xf32, #tpu.memory_space<vmem>>, vector<16x1xf32>
    %111 = vector.broadcast %110 : vector<16x1xf32> to vector<16x16xf32>
    %112 = arith.addf %109, %111 : vector<16x16xf32>
    %cst_48 = arith.constant 0.000000e+00 : f32
    %113 = vector.broadcast %cst_48 : f32 to vector<16x16xf32>
    %114 = arith.maximumf %112, %113 : vector<16x16xf32>
    %c0_49 = arith.constant 0 : index
    %c0_50 = arith.constant 0 : index
    %115 = vector.load %arg11[%c0_49, %c0_50] : memref<16x16xbf16, #tpu.memory_space<vmem>>, vector<16x16xbf16>
    %116 = arith.truncf %114 : vector<16x16xf32> to vector<16x16xbf16>
    %cst_51 = arith.constant dense<0.000000e+00> : vector<16x16xf32>
    %117 = tpu.matmul %115, %116, %cst_51 {dimension_numbers = #tpu.dot_dimension_numbers<[1], [0], [0], [1], [0, 0, 1, 1], [], []>} : vector<16x16xbf16>, vector<16x16xbf16>, vector<16x16xf32> -> vector<16x16xf32>
    %c0_52 = arith.constant 0 : index
    %c0_53 = arith.constant 0 : index
    %118 = vector.load %arg12[%c0_52, %c0_53] : memref<16x1xf32, #tpu.memory_space<vmem>>, vector<16x1xf32>
    %119 = vector.broadcast %118 : vector<16x1xf32> to vector<16x16xf32>
    %120 = arith.mulf %117, %119 : vector<16x16xf32>
    %c0_54 = arith.constant 0 : index
    %c0_55 = arith.constant 0 : index
    %121 = vector.load %arg13[%c0_54, %c0_55] : memref<16x1xf32, #tpu.memory_space<vmem>>, vector<16x1xf32>
    %122 = vector.broadcast %121 : vector<16x1xf32> to vector<16x16xf32>
    %123 = arith.addf %120, %122 : vector<16x16xf32>
    %cst_56 = arith.constant 0.000000e+00 : f32
    %124 = vector.broadcast %cst_56 : f32 to vector<16x16xf32>
    %125 = arith.maximumf %123, %124 : vector<16x16xf32>
    %c0_57 = arith.constant 0 : index
    %c0_58 = arith.constant 0 : index
    %c0_59 = arith.constant 0 : index
    %126 = vector.load %arg14[%c0_57, %c0_58, %c0_59] : memref<1x16x16xf32, #tpu.memory_space<vmem>>, vector<1x16x16xf32>
    %127 = vector.shape_cast %126 : vector<1x16x16xf32> to vector<16x16xf32>
    %128 = vector.shape_cast %125 : vector<16x16xf32> to vector<1x16x16xf32>
    tpu.vector_store %arg14[%c0_57, %c0_58, %c0_59], %128 {strides = array<i32>} : memref<1x16x16xf32, #tpu.memory_space<vmem>>, vector<1x16x16xf32>,
    return
  }
  func.func @transform_0(%arg0: i32, %arg1: i32) -> (i32, i32, i32) {
    %c0_i32 = arith.constant 0 : i32
    %c0_i32_0 = arith.constant 0 : i32
    return %arg0, %arg1, %c0_i32 : i32, i32, i32
  }
  func.func @transform_1(%arg0: i32, %arg1: i32) -> (i32, i32, i32) {
    %c0_i32 = arith.constant 0 : i32
    %c0_i32_0 = arith.constant 0 : i32
    %c0_i32_1 = arith.constant 0 : i32
    return %arg0, %c0_i32, %c0_i32_0 : i32, i32, i32
  }
  func.func @transform_2(%arg0: i32, %arg1: i32) -> (i32, i32, i32) {
    %c0_i32 = arith.constant 0 : i32
    %c0_i32_0 = arith.constant 0 : i32
    %c0_i32_1 = arith.constant 0 : i32
    return %arg0, %c0_i32, %c0_i32_0 : i32, i32, i32
  }
  func.func @transform_3(%arg0: i32, %arg1: i32) -> (i32, i32, i32) {
    %c0_i32 = arith.constant 0 : i32
    %c0_i32_0 = arith.constant 0 : i32
    return %arg0, %c0_i32, %arg1 : i32, i32, i32
  }
  func.func @transform_4(%arg0: i32, %arg1: i32) -> (i32, i32, i32) {
    %c0_i32 = arith.constant 0 : i32
    %c0_i32_0 = arith.constant 0 : i32
    %c0_i32_1 = arith.constant 0 : i32
    return %arg0, %c0_i32, %c0_i32_0 : i32, i32, i32
  }
  func.func @transform_5(%arg0: i32, %arg1: i32) -> (i32, i32) {
    %c0_i32 = arith.constant 0 : i32
    %c0_i32_0 = arith.constant 0 : i32
    %c0_i32_1 = arith.constant 0 : i32
    return %c0_i32, %c0_i32_0 : i32, i32
  }
  func.func @transform_6(%arg0: i32, %arg1: i32) -> (i32, i32) {
    %c0_i32 = arith.constant 0 : i32
    %c0_i32_0 = arith.constant 0 : i32
    %c0_i32_1 = arith.constant 0 : i32
    return %c0_i32, %c0_i32_0 : i32, i32
  }
  func.func @transform_7(%arg0: i32, %arg1: i32) -> (i32, i32) {
    %c0_i32 = arith.constant 0 : i32
    %c0_i32_0 = arith.constant 0 : i32
    %c0_i32_1 = arith.constant 0 : i32
    return %c0_i32, %c0_i32_0 : i32, i32
  }
  func.func @transform_8(%arg0: i32, %arg1: i32) -> (i32, i32) {
    %c0_i32 = arith.constant 0 : i32
    %c0_i32_0 = arith.constant 0 : i32
    %c0_i32_1 = arith.constant 0 : i32
    return %c0_i32, %c0_i32_0 : i32, i32
  }
  func.func @transform_9(%arg0: i32, %arg1: i32) -> (i32, i32) {
    %c0_i32 = arith.constant 0 : i32
    %c0_i32_0 = arith.constant 0 : i32
    %c0_i32_1 = arith.constant 0 : i32
    return %c0_i32, %c0_i32_0 : i32, i32
  }
  func.func @transform_10(%arg0: i32, %arg1: i32) -> (i32, i32) {
    %c0_i32 = arith.constant 0 : i32
    %c0_i32_0 = arith.constant 0 : i32
    %c0_i32_1 = arith.constant 0 : i32
    return %c0_i32, %c0_i32_0 : i32, i32
  }
  func.func @transform_11(%arg0: i32, %arg1: i32) -> (i32, i32) {
    %c0_i32 = arith.constant 0 : i32
    %c0_i32_0 = arith.constant 0 : i32
    %c0_i32_1 = arith.constant 0 : i32
    return %c0_i32, %c0_i32_0 : i32, i32
  }
  func.func @transform_12(%arg0: i32, %arg1: i32) -> (i32, i32, i32) {
    %c0_i32 = arith.constant 0 : i32
    %c0_i32_0 = arith.constant 0 : i32
    return %arg0, %c0_i32, %arg1 : i32, i32, i32
  }
}

</mosaic_0001>

<bundles_post_ra>
// kernel: tpu_custom_call.1
= control target key start
LH: loop header
LB: loop body
LE: loop exit
PB: predicated region body
PF: predicated region fallthrough
CT: control target
= control target key end

     0   :  { %s1873_s0 = inlined_call_operand.vmem [shape: f32[2,16,3], index: 0, kind: input, shape index: {}]   ;;  %s1874_s1 = inlined_call_operand.vmem [shape: f32[2,8,3], index: 1, kind: input, shape index: {}]   ;;  %s1875_s2 = inlined_call_operand.vmem [shape: f32[2,1,8], index: 2, kind: input, shape index: {}]   ;;  %s1876_s3 = inlined_call_operand.vmem [shape: f32[2,4,16], index: 3, kind: input, shape index: {}]   ;;  %s1877_s4 = inlined_call_operand.vmem [shape: f32[2,8,8], index: 4, kind: input, shape index: {}]   ;;  %s1878_s5 = inlined_call_operand.vmem [shape: bf16[16,4], index: 5, kind: input, shape index: {}]   ;;  %s1879_s6 = inlined_call_operand.vmem [shape: bf16[16,8], index: 6, kind: input, shape index: {}]   ;;  %s1880_s7 = inlined_call_operand.vmem [shape: f32[16,1], index: 7, kind: input, shape index: {}]   ;;  %s1881_s8 = inlined_call_operand.vmem [shape: f32[16,1], index: 8, kind: input, shape index: {}]   ;;  %s1882_s9 = inlined_call_operand.vmem [shape: bf16[16,16], index: 9, kind: input, shape index: {}]   ;;  %s1883_s10 = inlined_call_operand.vmem [shape: f32[16,1], index: 10, kind: input, shape index: {}]   ;;  %s1884_s11 = inlined_call_operand.vmem [shape: f32[16,1], index: 11, kind: input, shape index: {}]   ;;  %s1885_s12 = inlined_call_operand.hbm [shape: f32[2,16,16], index: 12, kind: output, shape index: {}]  }
   0x1   :  { %1887 = sst [smem:[#allocation6_spill]] %s1873_s0 }
   0x2   :  { %1888 = sst [smem:[#allocation7_spill]] %s1874_s1 }
   0x3   :  { %17 = vsyncpa [#allocation3], 0 }
   0x4   :  { %19 = vsyncpa [#allocation3 + $0x1], 0  ;;  %s1583_s21 = smov 0   ;;  %s1585_s22 = smov 0  }
   0x5   :  { %s1587_s23 = smov 0   ;;  %s1589_s24 = smov 0  }
   0x6   :  { %s1591_s25 = smov 0   ;;  %s1593_s26 = smov 0  }
   0x7 LB: > { %s1266_s27 = sadd.s32 4294967295, %s1510_s26   ;;  %s1267_s28 = sadd.s32 4294967294, %s1510_s26   ;;  %s1510_s26 = sphi %s1593_s26, %s25_s26   ;;  %s1506_s25 = sphi %s1591_s25, %s1899_s25   ;;  %s1502_s24 = sphi %s1589_s24, %s1898_s24   ;;  %s1498_s23 = sphi %s1587_s23, %s1897_s23   ;;  %s1494_s22 = sphi %s1585_s22, %s1896_s22   ;;  %s1490_s21 = sphi %s1583_s21, %s1895_s21  }
   0x8   : > { %s37_s29 = sadd.s32 1, %s1506_s25  ;;  %s327_s30 = sadd.s32 1, %s1498_s23 }
   0x9   : > { %p39_p0 = scmp.ge.s32.totalorder %s37_s29, 2  ;;  %p337_p1 = scmp.ne.s32.totalorder %s1498_s23, %s1494_s22 }
   0xa   : > { %p338_p2 = scmp.eq.s32.totalorder %s1266_s27, 1  ;;  %p343_p3 = scmp.ne.s32.totalorder %s1494_s22, %s1490_s21 }
   0xb   : > { %s1901_s29 = smov (%p39_p0, %s37_s29), 0  ;;  %p344_p5 = scmp.eq.s32.totalorder %s1267_s28, 1 }
   0xc   : > { %1889 = sst [smem:[#allocation5_spill]] %s1901_s29  ;;  %p1623_p4 = por %p338_p2, %p337_p1 }
   0xd   : > { %s322_s14 = ssub.s32 %s1506_s25, %s1901_s29  ;;  %p1270_p6 = scmp.ge.s32.totalorder %s1510_s26, 1 }
   0xe   : > { %p325_p7 = scmp.eq.s32.totalorder %s322_s14, 0  ;;  %p1630_p8 = por %p344_p5, %p343_p3 }
   0xf   : > { %p426_p9 = scmp.lt.s32.totalorder %s1510_s26, 3 }
  0x10   : > { %s1636_s16 = scalar_select %p325_p7, %s1498_s23, %s327_s30  }
  0x11   : > { %p427_p10 = pnand %p1270_p6, %p426_p9 }
  0x12   : > { %p491_p11 = scmp.lt.s32.totalorder (!%p427_p10), %s1502_s24, 1  ;;  %vm525_vm0 = vcmask (!%p427_p10), 23552   ;;  %s1892_s1 = sld [smem:[#allocation7_spill]] (!%p427_p10)  ;;  %vm630_vm1 = vcmask (!%p427_p10), 64512   ;;  %v628_v12 = vlaneseq (!%p427_p10) }
  0x13   : > { %430 = sbr.rel (%p427_p10) target bundleno = 2286 (0x8ee), region = 68  ;;  %s1893_s0 = sld [smem:[#allocation6_spill]] (!%p427_p10) }
  0x14   : > { %v1668_v13 = vand.u32 (!%p427_p10), 127, %v628_v12  ;;  %s1515_s27 = smov (!%p427_p10), [#allocation2]  }
  0x1a   : > { %s1640_s17 = scalar_select %p491_p11, %s1502_s24, 1 }
  0x1c   : > { %s1274_s18 = sshll.u32 %s1640_s17, 3  ;;  %s1293_s19 = sshll.u32 %s1640_s17, 4 }
  0x1d   : > { %s503_s28 = scalar_lea.vmem %s1892_s1, %s1274_s18  ;;  %s498_s29 = scalar_lea.vmem %s1893_s0, %s1293_s19 }
  0x1e   : > { %v521_v0 = vld [vmem:[%s503_s28] sm:$0xff]  ;;  %v1656_v2 = vld [vmem:[%s498_s29 + $0x8] sm:$0xff]  ;;  %s506_s28 = scalar_lea.vmem %s1875_s2, %s1640_s17  ;;  %s517_s30 = scalar_lea.vmem %s1877_s4, %s1274_s18 }
  0x1f   : > { %1306 = vmatprep.subr.msk.mxu0 %vm525_vm0, %v521_v0  ;;  %v1653_v1 = vld [vmem:[%s498_s29] sm:$0xff]  ;;  %s1275_s19 = sshll.u32 %s1640_s17, 2  ;;  %s487_s29 = sand.u32 1, %s1494_s22  }
  0x20   : > { %1307 = vmatpush3.xpose.msk.msra.mxu0 %vm525_vm0, %v521_v0  ;;  %1308 = vmatprep.mubr.msk.f32.mxu0 %vm525_vm0, %v1653_v1  ;;  %v1280_v4 = vld [vmem:[%s506_s28] ss:$0 sm:$0xff]  ;;  %s513_s20 = scalar_lea.vmem %s1876_s3, %s1275_s19  ;;  %s1271_s19 = sshll.u32 %s487_s29, 4 }
  0x21   : > { %s489_s14 = scalar_lea.vmem [#allocation2], %s1271_s19  ;;  %s1436_s28 = sshll.u32 %s1515_s27, 4  ;;  %s1437_s28 = int_to_ptr.vmem [resolvable:$false] %s1436_s28 }
  0x22   : > { %s1438_s19 = scalar_lea.vmem %s1437_s28, 512 }
  0x23   : > { %1309 = vmatmul.mubr.msk.f32.vlgmr.msra.gmra.mrb[0].mxu0 %vm525_vm0, %v1656_v2 }
  0xf6   : > { %v1310_v3 = vpop.f32.mrb[0].mxu0 }
  0xf7   : > { %v601_v5 = vpop.f32.mrb[1].mxu0  ;;  %v611_v6 = vmul.f32 2.0, %v1310_v3 }
  0xf8   : > { %v610_v7 = vmul.f32 2.0, %v601_v5 }
  0xf9   : > { %v619_v9 = vsub.f32 %v1280_v4, %v611_v6 }
  0xfa   : > { %v618_v8 = vsub.f32 %v1280_v4, %v610_v7 }
  0xfb   : > { %v634_v11 = vsel %vm630_vm1, %v619_v9, inf }
  0xfc   : > { %v631_v10 = vsel %vm630_vm1, %v618_v8, inf }
  0xfd   : > { %632 = vmin.xlane.f32.xlu0 %v631_v10 }
 0x101   : > { %635 = vmin.xlane.f32.xlu0 %v634_v11 }
 0x18a   : > { %v1670_v14 = vpop.xlane.xlu0 %632 }
 0x18b   : > { %vm637_vm2 = vcmp.eq.f32.partialorder %v618_v8, %v1670_v14 }
 0x18c   : > { %v639_v15 = vsel %vm637_vm2, %v1668_v13, 8 }
 0x18d   : > { %v641_v16 = vsel %vm630_vm1, %v639_v15, 2147483647 }
 0x18e   : > { %v1675_v17 = vpop.xlane.xlu0 %635  ;;  %v643_v18 = vshra.s32 %v641_v16, 16  ;;  %v642_v24 = vand.u32 65535, %v641_v16 }
 0x18f   : > { %vm638_vm3 = vcmp.eq.f32.partialorder %v619_v9, %v1675_v17 }
 0x190   : > { %v640_v19 = vsel %vm638_vm3, %v1668_v13, 8  ;;  %v645_v20 = vcvt.s32.f32 %v643_v18  ;;  %v644_v26 = vcvt.s32.f32 %v642_v24  ;;  %v620_v24 = vmul.f32 %v1653_v1, %v1653_v1 }
 0x191   : > { %v656_v21 = vsel %vm630_vm1, %v640_v19, 2147483647 }
 0x192   : > { %646 = vmin.xlane.f32.xlu1 %v645_v20  ;;  %v658_v22 = vshra.s32 %v656_v21, 16  ;;  %v657_v27 = vand.u32 65535, %v656_v21 }
 0x194   : > { %v660_v23 = vcvt.s32.f32 %v658_v22  ;;  %v659_v30 = vcvt.s32.f32 %v657_v27 }
 0x196   : > { %661 = vmin.xlane.f32.xlu1 %v660_v23 }
 0x21f   : > { %v647_v25 = vpop.xlane.xlu1 %646 }
 0x220   : > { %vm648_vm4 = vcmp.eq.f32.partialorder %v645_v20, %v647_v25  ;;  %v653_v32 = vcvt.f32.s32 %v647_v25 }
 0x221   : > { %v649_v28 = vsel %vm648_vm4, %v644_v26, inf }
 0x222   : > { %650 = vmin.xlane.f32.xlu0 %v649_v28  ;;  %v654_v34 = vshll.u32 %v653_v32, 16 }
 0x223   : > { %v662_v29 = vpop.xlane.xlu1 %661 }
 0x224   : > { %vm663_vm5 = vcmp.eq.f32.partialorder %v660_v23, %v662_v29  ;;  %v668_v35 = vcvt.f32.s32 %v662_v29  ;;  %v622_v29 = vsel %vm525_vm0, %v620_v24, 0.0 }
 0x225   : > { %v664_v31 = vsel %vm663_vm5, %v659_v30, inf  ;;  %v621_v30 = vmul.f32 %v1656_v2, %v1656_v2 }
 0x226   : > { %665 = vmin.xlane.f32.xlu1 %v664_v31  ;;  %v669_v39 = vshll.u32 %v668_v35, 16 }
 0x227   : > { %v625_v32 = vsel %vm525_vm0, %v621_v30, 0.0  ;;  %vm1513_vm0 = vmmov 0  }
 0x2af   : > { %v651_v33 = vpop.xlane.xlu0 %650 }
 0x2b0   : > { %v652_v36 = vcvt.f32.s32 %v651_v33 }
 0x2b2   : > { %v1680_v37 = vadd.s32 %v654_v34, %v652_v36 }
 0x2b3   : > { %v666_v38 = vpop.xlane.xlu1 %665 }
 0x2b4   : > { %v667_v40 = vcvt.f32.s32 %v666_v38  ;;  %vm671_vm6 = vcmp.eq.s32.totalorder %v1668_v13, %v1680_v37 }
 0x2b5   : > { %v701_v41 = vsel %vm671_vm6, 1e+30, %v618_v8 }
 0x2b6   : > { %v1687_v42 = vadd.s32 %v669_v39, %v667_v40  ;;  %v703_v43 = vsel %vm630_vm1, %v701_v41, inf  ;;  %v1512_v40 = vmov 0.0  }
 0x2b7   : > { %704 = vmin.xlane.f32.xlu0 %v703_v43  ;;  %1311 = vmatprep.subr.bf16.mxu1 %v1512_v40 }
 0x2b8   : > { %vm672_vm7 = vcmp.eq.s32.totalorder %v1668_v13, %v1687_v42  ;;  %1317 = vmatprep.subr.bf16.mxu0 %v1512_v40  ;;  %1313 = vmatprep.mubr.msk.bf16.mxu1 %vm1513_vm0, %v1512_v40 }
 0x2b9   : > { %v702_v44 = vsel %vm672_vm7, 1e+30, %v619_v9  ;;  %1319 = vmatprep.mubr.msk.bf16.mxu0 %vm1513_vm0, %v1512_v40 }
 0x2ba   : > { %v706_v45 = vsel %vm630_vm1, %v702_v44, inf }
 0x2bb   : > { %707 = vmin.xlane.f32.xlu1 %v706_v45 }
 0x344   : > { %v1696_v46 = vpop.xlane.xlu0 %704 }
 0x345   : > { %vm709_vm8 = vcmp.eq.f32.partialorder %v701_v41, %v1696_v46 }
 0x346   : > { %v711_v47 = vsel %vm709_vm8, %v1668_v13, 8 }
 0x347   : > { %v713_v48 = vsel %vm630_vm1, %v711_v47, 2147483647 }
 0x348   : > { %v1701_v49 = vpop.xlane.xlu1 %707  ;;  %v715_v50 = vshra.s32 %v713_v48, 16  ;;  %v714_v56 = vand.u32 65535, %v713_v48 }
 0x349   : > { %vm710_vm9 = vcmp.eq.f32.partialorder %v702_v44, %v1701_v49 }
 0x34a   : > { %v712_v51 = vsel %vm710_vm9, %v1668_v13, 8  ;;  %v717_v52 = vcvt.s32.f32 %v715_v50  ;;  %v716_v58 = vcvt.s32.f32 %v714_v56 }
 0x34b   : > { %v728_v53 = vsel %vm630_vm1, %v712_v51, 2147483647 }
 0x34c   : > { %718 = vmin.xlane.f32.xlu0 %v717_v52  ;;  %v730_v54 = vshra.s32 %v728_v53, 16  ;;  %v729_v59 = vand.u32 65535, %v728_v53 }
 0x34e   : > { %v732_v55 = vcvt.s32.f32 %v730_v54  ;;  %v731_v62 = vcvt.s32.f32 %v729_v59 }
 0x350   : > { %733 = vmin.xlane.f32.xlu1 %v732_v55 }
 0x3d9   : > { %v719_v57 = vpop.xlane.xlu0 %718 }
 0x3da   : > { %vm720_vm10 = vcmp.eq.f32.partialorder %v717_v52, %v719_v57  ;;  %v725_v0 = vcvt.f32.s32 %v719_v57 }
 0x3db   : > { %v721_v60 = vsel %vm720_vm10, %v716_v58, inf }
 0x3dc   : > { %722 = vmin.xlane.f32.xlu0 %v721_v60  ;;  %v726_v4 = vshll.u32 %v725_v0, 16 }
 0x3dd   : > { %v734_v61 = vpop.xlane.xlu1 %733 }
 0x3de   : > { %vm735_vm11 = vcmp.eq.f32.partialorder %v732_v55, %v734_v61  ;;  %v740_v5 = vcvt.f32.s32 %v734_v61 }
 0x3df   : > { %v736_v63 = vsel %vm735_vm11, %v731_v62, inf }
 0x3e0   : > { %737 = vmin.xlane.f32.xlu1 %v736_v63  ;;  %v741_v9 = vshll.u32 %v740_v5, 16 }
 0x469   : > { %v723_v3 = vpop.xlane.xlu0 %722 }
 0x46a   : > { %v724_v6 = vcvt.f32.s32 %v723_v3 }
 0x46c   : > { %v1706_v7 = vadd.s32 %v726_v4, %v724_v6 }
 0x46d   : > { %v738_v8 = vpop.xlane.xlu1 %737 }
 0x46e   : > { %v739_v10 = vcvt.f32.s32 %v738_v8  ;;  %vm743_vm12 = vcmp.eq.s32.totalorder %v1668_v13, %v1706_v7 }
 0x46f   : > { %v773_v11 = vsel %vm743_vm12, 1e+30, %v701_v41 }
 0x470   : > { %v1713_v12 = vadd.s32 %v741_v9, %v739_v10  ;;  %v775_v15 = vsel %vm630_vm1, %v773_v11, inf }
 0x471   : > { %776 = vmin.xlane.f32.xlu0 %v775_v15 }
 0x472   : > { %vm744_vm13 = vcmp.eq.s32.totalorder %v1668_v13, %v1713_v12 }
 0x473   : > { %v774_v16 = vsel %vm744_vm13, 1e+30, %v702_v44 }
 0x474   : > { %v778_v18 = vsel %vm630_vm1, %v774_v16, inf }
 0x475   : > { %779 = vmin.xlane.f32.xlu1 %v778_v18 }
 0x4fe   : > { %v777_v19 = vpop.xlane.xlu0 %776 }
 0x4ff   : > { %vm781_vm14 = vcmp.eq.f32.partialorder %v773_v11, %v777_v19 }
 0x500   : > { %v783_v20 = vsel %vm781_vm14, %v1668_v13, 8 }
 0x501   : > { %v785_v21 = vsel %vm630_vm1, %v783_v20, 2147483647 }
 0x502   : > { %v780_v22 = vpop.xlane.xlu1 %779  ;;  %v787_v23 = vshra.s32 %v785_v21, 16  ;;  %v786_v1 = vand.u32 65535, %v785_v21 }
 0x503   : > { %vm782_vm15 = vcmp.eq.f32.partialorder %v774_v16, %v780_v22 }
 0x504   : > { %v784_v25 = vsel %vm782_vm15, %v1668_v13, 8  ;;  %v789_v26 = vcvt.s32.f32 %v787_v23  ;;  %v788_v34 = vcvt.s32.f32 %v786_v1 }
 0x505   : > { %v800_v27 = vsel %vm630_vm1, %v784_v25, 2147483647 }
 0x506   : > { %790 = vmin.xlane.f32.xlu0 %v789_v26  ;;  %v802_v28 = vshra.s32 %v800_v27, 16  ;;  %v801_v36 = vand.u32 65535, %v800_v27 }
 0x508   : > { %v804_v31 = vcvt.s32.f32 %v802_v28  ;;  %v803_v39 = vcvt.s32.f32 %v801_v36 }
 0x50a   : > { %805 = vmin.xlane.f32.xlu1 %v804_v31  ;;  %623 = vadd.xlane.f32.xlu0 %v622_v29 }
 0x50e   : > { %626 = vadd.xlane.f32.xlu1 %v625_v32 }
 0x593   : > { %v1732_v33 = vpop.xlane.xlu0 %790 }
 0x594   : > { %vm792_vm2 = vcmp.eq.f32.partialorder %v789_v26, %v1732_v33 }
 0x595   : > { %v793_v35 = vsel %vm792_vm2, %v788_v34, inf }
 0x596   : > { %794 = vmin.xlane.f32.xlu0 %v793_v35 }
 0x597   : > { %v1735_v38 = vpop.xlane.xlu1 %805  ;;  %v624_v41 = vpop.xlane.xlu0 %623 }
 0x598   : > { %vm807_vm3 = vcmp.eq.f32.partialorder %v804_v31, %v1735_v38  ;;  %v673_v44 = vadd.f32 %v1670_v14, %v624_v41  ;;  %v745_v45 = vadd.f32 %v1696_v46, %v624_v41  ;;  %v817_v54 = vadd.f32 %v777_v19, %v624_v41 }
 0x599   : > { %v808_v2 = vsel %vm807_vm3, %v803_v39, inf  ;;  %v797_v41 = vcvt.f32.s32 %v1732_v33 }
 0x59a   : > { %809 = vmin.xlane.f32.xlu1 %v808_v2  ;;  %v675_v50 = vmax.f32 %v673_v44, 0.0  ;;  %v747_v51 = vmax.f32 %v745_v45, 0.0  ;;  %v819_v56 = vmax.f32 %v817_v54, 0.0 }
 0x59b   : > { %v627_v43 = vpop.xlane.xlu1 %626 }
 0x59c   : > { %v674_v47 = vadd.f32 %v1675_v17, %v627_v43  ;;  %v746_v48 = vadd.f32 %v1701_v49, %v627_v43  ;;  %1404 = vrsqrt.f32 %v675_v50  ;;  %v818_v55 = vadd.f32 %v780_v22, %v627_v43 }
 0x59d   : > { %1406 = vrsqrt.f32 %v747_v51  ;;  %vm679_vm4 = vcmp.eq.f32.partialorder %v675_v50, inf  ;;  %vm751_vm5 = vcmp.eq.f32.partialorder %v747_v51, inf  ;;  %v682_v0 = vand.u32 2147483648, %v675_v50 }
 0x59e   : > { %v676_v52 = vmax.f32 %v674_v47, 0.0  ;;  %v748_v53 = vmax.f32 %v746_v48, 0.0  ;;  %v820_v57 = vmax.f32 %v818_v55, 0.0  ;;  %vm681_vm9 = vcmp.eq.f32.partialorder %v675_v50, 0.0 }
 0x59f   : > { %v754_v5 = vand.u32 2147483648, %v747_v51  ;;  %vm753_vm11 = vcmp.eq.f32.partialorder %v747_v51, 0.0  ;;  %vm823_vm2 = vcmp.eq.f32.partialorder %v819_v56, inf  ;;  %v826_v25 = vand.u32 2147483648, %v819_v56 }
 0x5a0   : > { %1408 = vrsqrt.f32 %v676_v52  ;;  %vm686_vm8 = vcmp.eq.f32.partialorder %v676_v52, inf  ;;  %vm758_vm10 = vcmp.eq.f32.partialorder %v748_v53, inf  ;;  %v689_v8 = vand.u32 2147483648, %v676_v52 }
 0x5a1   : > { %1410 = vrsqrt.f32 %v748_v53  ;;  %vm688_vm14 = vcmp.eq.f32.partialorder %v676_v52, 0.0  ;;  %v761_v15 = vand.u32 2147483648, %v748_v53  ;;  %vm760_vm15 = vcmp.eq.f32.partialorder %v748_v53, 0.0 }
 0x5a2   : > { %1412 = vrsqrt.f32 %v819_v56  ;;  %vm830_vm3 = vcmp.eq.f32.partialorder %v820_v57, inf  ;;  %v833_v28 = vand.u32 2147483648, %v820_v57 }
 0x5a3   : > { %1414 = vrsqrt.f32 %v820_v57 }
 0x5a6   : > { %v1405_v14 = vpop.eup %1404 }
 0x5a7   : > { %v1407_v46 = vpop.eup %1406  ;;  %v678_v59 = vmul.f32 %v1405_v14, %v675_v50 }
 0x5a8   : > { %v750_v49 = vmul.f32 %v1407_v46, %v747_v51 }
 0x5a9   : > { %v680_v62 = vsel %vm679_vm4, %v675_v50, %v678_v59  ;;  %vm825_vm4 = vcmp.eq.f32.partialorder %v819_v56, 0.0  ;;  %v798_v50 = vshll.u32 %v797_v41, 16 }
 0x5aa   : > { %v1409_v58 = vpop.eup %1408  ;;  %v752_v3 = vsel %vm751_vm5, %v747_v51, %v750_v49  ;;  %v683_v10 = vsel %vm681_vm9, %v682_v0, %v680_v62  ;;  %vm832_vm5 = vcmp.eq.f32.partialorder %v820_v57, 0.0  ;;  %v524_v0 = vld [vmem:[%s517_s30] sm:$0xff]  ;;  %s1294_s30 = sshll.u32 %s1502_s24, 8  ;;  %s1827_s24 = scalar_lea.sflag [#allocation3], %s487_s29 }
 0x5ab   : > { %v1411_v17 = vpop.eup %1410  ;;  %v685_v60 = vmul.f32 %v1409_v58, %v676_v52  ;;  %v755_v16 = vsel %vm753_vm11, %v754_v5, %v752_v3  ;;  %v691_v20 = vadd.f32 1e-08, %v683_v10  ;;  %v1011_v3 = vld [vmem:[%s1880_s7 + $0x8] sm:$0xff]  ;;  %v1010_v5 = vld [vmem:[%s1880_s7] sm:$0xff]  ;;  %s1821_s17 = scalar_lea.hbm %s1885_s12, %s1294_s30 }
 0x5ac   : > { %v757_v61 = vmul.f32 %v1411_v17, %v748_v53  ;;  %v1413_v63 = vpop.eup %1412  ;;  %v763_v22 = vadd.f32 1e-08, %v755_v16  ;;  %v1094_v10 = vld [vmem:[%s1883_s10 + $0x8] sm:$0xff]  ;;  %v523_v16 = vld [vmem:[%s513_s20] sm:$0xf]  ;;  %s1140_s20 = sshll.u32 %s489_s14, 4  ;;  %s1823_s20 = int_to_ptr.vmem [resolvable:$true] %s1140_s20 }
 0x5ad   : > { %v1415_v4 = vpop.eup %1414  ;;  %v687_v6 = vsel %vm686_vm8, %v676_v52, %v685_v60  ;;  %v822_v11 = vmul.f32 %v1413_v63, %v819_v56  ;;  %1416 = vrcp.f32 %v691_v20  ;;  %v812_v52 = vcvt.f32.s32 %v1735_v38  ;;  %s1432_s18 = scalar_lea.vmem %s1823_s20, 256  ;;  %p1439_p1 = scmp.lt.s32.totalorder %s1823_s20, %s1437_s28 }
 0x5ae   : > { %v759_v9 = vsel %vm758_vm10, %v748_v53, %v757_v61  ;;  %v829_v18 = vmul.f32 %v1415_v4, %v820_v57  ;;  %v690_v19 = vsel %vm688_vm14, %v689_v8, %v687_v6  ;;  %1418 = vrcp.f32 %v763_v22  ;;  %v1024_v6 = vld [vmem:[%s1881_s8] sm:$0xff]  ;;  %v1025_v8 = vld [vmem:[%s1881_s8 + $0x8] sm:$0xff]  ;;  %p1433_p12 = scmp.ne.s32.totalorder %s1823_s20, %s1432_s18  ;;  %p1440_p2 = scmp.lt.s32.totalorder %s1438_s19, %s1432_s18 }
 0x5af   : > { %v762_v21 = vsel %vm760_vm15, %v761_v15, %v759_v9  ;;  %v824_v23 = vsel %vm823_vm2, %v819_v56, %v822_v11  ;;  %v692_v24 = vadd.f32 1e-08, %v690_v19  ;;  %v813_v56 = vshll.u32 %v812_v52, 16  ;;  %v1093_v9 = vld [vmem:[%s1883_s10] sm:$0xff]  ;;  %v1108_v15 = vld [vmem:[%s1884_s11 + $0x8] sm:$0xff] }
 0x5b0   : > { %v831_v26 = vsel %vm830_vm3, %v820_v57, %v829_v18  ;;  %v764_v27 = vadd.f32 1e-08, %v762_v21  ;;  %v827_v29 = vsel %vm825_vm4, %v826_v25, %v824_v23  ;;  %v1514_v4 = vmov 0   ;;  %v1107_v11 = vld [vmem:[%s1884_s11] sm:$0xff]  ;;  %p1434_p13 = pnand %p1433_p12, %p1623_p4  ;;  %p1441_p3 = por %p1440_p2, %p1439_p1 }
 0x5b1   : > { %v834_v30 = vsel %vm832_vm5, %v833_v28, %v831_v26  ;;  %1420 = vrcp.f32 %v692_v24  ;;  %v835_v31 = vadd.f32 1e-08, %v827_v29  ;;  %1400 = vset.pattern.permute.xlu1 %v1514_v4  ;;  %1399 = vset.pattern.permute.xlu0 %v1514_v4  ;;  %v899_v21 = vpack.c.bf16 %v523_v16, %v523_v16  ;;  %v1401_v25 = vld [vmem:[%s1879_s6] sm:$0xff]  }
 0x5b2   : > { %1422 = vrcp.f32 %v764_v27  ;;  %v836_v32 = vadd.f32 1e-08, %v834_v30  ;;  %1019 = vperm.xlu1 %1400, %v1011_v3   ;;  %1014 = vperm.xlu0 %1399, %v1010_v5   ;;  %v1402_v27 = vld [vmem:[%s1878_s5] sm:$0xff]   ;;  %p1435_p0 = pneg %p1434_p13 }
 0x5b3   : > { %1424 = vrcp.f32 %v835_v31 }
 0x5b4   : > { %1426 = vrcp.f32 %v836_v32  ;;  %p1442_p5 = pnand %p1441_p3, %p1435_p0 }
 0x5b6   : > { %1028 = vperm.xlu1 %1400, %v1024_v6  }
 0x5b7   : > { %v1417_v1 = vpop.eup %1416 }
 0x5b8   : > { %v1419_v34 = vpop.eup %1418  ;;  %v695_v55 = vsel %vm671_vm6, %v1417_v1, 0.0 }
 0x5b9   : > { %v771_v39 = vadd.f32 %v1419_v34, %v1417_v1  ;;  %v767_v33 = vsel %vm743_vm12, %v1419_v34, 0.0  ;;  %vm965_vm12 = vcmask 1041408  }
 0x5ba   : > { %v769_v17 = vadd.f32 %v767_v33, %v695_v55  ;;  %1033 = vperm.xlu1 %1400, %v1025_v8   ;;  %v967_v26 = vsel %vm965_vm12, %v899_v21, 0 }
 0x5bb   : > { %v1421_v35 = vpop.eup %1420 }
 0x5bc   : > { %v1423_v36 = vpop.eup %1422  ;;  %v696_v38 = vsel %vm672_vm7, %v1421_v35, 0.0  ;;  %vm911_vm7 = vcmask 1043456  }
 0x5bd   : > { %v772_v2 = vadd.f32 %v1423_v36, %v1421_v35  ;;  %v1425_v43 = vpop.eup %1424  ;;  %v768_v46 = vsel %vm744_vm13, %v1423_v36, 0.0  ;;  %vm961_vm13 = vcmask 31744  }
 0x5be   : > { %v1427_v44 = vpop.eup %1426  ;;  %v843_v45 = vadd.f32 %v1425_v43, %v771_v39  ;;  %v770_v37 = vadd.f32 %v768_v46, %v696_v38  ;;  %1097 = vperm.xlu1 %1400, %v1093_v9  }
 0x5bf   : > { %v844_v48 = vadd.f32 %v1427_v44, %v772_v2 }
 0x5c0   : > { %1428 = vrcp.f32 %v843_v45  ;;  %v1403_v45 = vld [vmem:[%s1882_s9] sm:$0xff]  }
 0x5c1   : > { %1430 = vrcp.f32 %v844_v48 }
 0x5c2   : > { %1102 = vperm.xlu1 %1400, %v1094_v10  }
 0x5c6   : > { %1111 = vperm.xlu1 %1400, %v1107_v11  }
 0x5ca   : > { %v1429_v49 = vpop.eup %1428  ;;  %1116 = vperm.xlu1 %1400, %v1108_v15  }
 0x5cb   : > { %v1431_v61 = vpop.eup %1430 }
 0x623   : > { %v795_v47 = vpop.xlane.xlu0 %794 }
 0x624   : > { %v796_v51 = vcvt.f32.s32 %v795_v47 }
 0x626   : > { %v799_v53 = vadd.s32 %v798_v50, %v796_v51 }
 0x627   : > { %v810_v54 = vpop.xlane.xlu1 %809 }
 0x628   : > { %vm815_vm8 = vcmp.eq.s32.totalorder %v1668_v13, %v799_v53  ;;  %v811_v57 = vcvt.f32.s32 %v810_v54 }
 0x629   : > { %v839_v14 = vsel %vm815_vm8, %v1425_v43, 0.0 }
 0x62a   : > { %v814_v58 = vadd.s32 %v813_v56, %v811_v57  ;;  %v841_v59 = vadd.f32 %v839_v14, %v769_v17 }
 0x62c   : > { %vm816_vm6 = vcmp.eq.s32.totalorder %v1668_v13, %v814_v58  ;;  %v847_v62 = vmul.f32 %v1429_v49, %v841_v59  ;;  %v850_v13 = vpack.c.bf16 %v524_v0, %v524_v0 }
 0x62d   : > { %v840_v7 = vsel %vm816_vm6, %v1427_v44, 0.0 }
 0x62e   : > { %v842_v60 = vadd.f32 %v840_v7, %v770_v37 }
 0x630   : > { %v848_v63 = vmul.f32 %v1431_v61, %v842_v60 }
 0x631   : > { %v1020_v28 = vpop.permute.xlu1 %1019  ;;  %v1015_v30 = vpop.permute.xlu0 %1014 }
 0x632   : > { %v849_v42 = vpack.c.bf16 %v848_v63, %v847_v62 }
 0x634   : > { %v855_v12 = vsel %vm630_vm1, %v849_v42, 0 }
 0x635   : > { %1312 = vmatpush3.bf16.xpose.msra.mxu1 %v855_v12  ;;  %v1029_v29 = vpop.permute.xlu1 %1028 }
 0x636   : > { %1329 = vmatprep.subr.bf16.mxu1 %v1512_v40 }
 0x639   : > { %v1034_v2 = vpop.permute.xlu1 %1033 }
 0x63c   : > { %1314 = vmatmul.mubr.msk.bf16.vlgmr.msra.gmra.mrb[0].mxu1 %vm630_vm1, %v850_v13 }
 0x63d   : > { %1331 = vmatprep.mubr.msk.bf16.mxu1 %vm1513_vm0, %v1512_v40  ;;  %v1098_v47 = vpop.permute.xlu1 %1097 }
 0x641   : > { %v1103_v48 = vpop.permute.xlu1 %1102 }
 0x645   : > { %v1112_v50 = vpop.permute.xlu1 %1111 }
 0x649   : > { %v1117_v57 = vpop.permute.xlu1 %1116 }
 0x70f   : > { %v891_v18 = vpop.f32.mrb[0].mxu1 }
 0x710   : > { %v902_v19 = vpack.c.bf16 %v891_v18, %v891_v18  ;;  %v1315_v20 = vpop.f32.mrb[1].mxu1 }
 0x711   : > { %v894_v22 = vpop.f32.mrb[2].mxu1 }
 0x712   : > { %v913_v23 = vsel %vm911_vm7, %v902_v19, 0  ;;  %v1316_v24 = vpop.f32.mrb[3].mxu1 }
 0x713   : > { %1318 = vmatpush3.bf16.msra.mxu0 %v913_v23 }
 0x714   : > { %1323 = vmatprep.subr.bf16.mxu0 %v1512_v40 }
 0x716   : > { %1320 = vmatmul.mubr.msk.bf16.vlgmr.msra.gmra.mrb[4].mxu0 %vm630_vm1, %v1401_v25  ;;  %vm1048_vm1 = vcmask 130048  }
 0x717   : > { %1324 = vmatpush3.bf16.msra.mxu0 %v967_v26  ;;  %1325 = vmatprep.mubr.msk.bf16.mxu0 %vm1513_vm0, %v1512_v40 }
 0x722   : > { %1326 = vmatmul.mubr.msk.bf16.vlgmr.msra.gmra.mrb[4].mxu0 %vm961_vm13, %v1402_v27 }
 0x7f5   : > { %v1003_v31 = vpop.f32.mrb[4].mxu0 }
 0x7f6   : > { %v1022_v32 = vmul.f32 %v1015_v30, %v1003_v31  ;;  %v1327_v1 = vpop.f32.mrb[5].mxu0 }
 0x7f7   : > { %v1006_v34 = vpop.f32.mrb[6].mxu0 }
 0x7f8   : > { %v1036_v35 = vadd.f32 %v1029_v29, %v1022_v32  ;;  %v1023_v36 = vmul.f32 %v1020_v28, %v1006_v34  ;;  %v1328_v39 = vpop.f32.mrb[7].mxu0 }
 0x7fa   : > { %v1037_v41 = vadd.f32 %v1034_v2, %v1023_v36  ;;  %v1038_v40 = vmax.f32 %v1036_v35, 0.0 }
 0x7fc   : > { %v1039_v43 = vmax.f32 %v1037_v41, 0.0 }
 0x7fe   : > { %v1042_v44 = vpack.c.bf16 %v1039_v43, %v1038_v40 }
 0x800   : > { %1330 = vmatpush3.bf16.msra.mxu1 %v1042_v44 }
 0x803   : > { %1332 = vmatmul.mubr.msk.bf16.vlgmr.msra.gmra.mrb[4].mxu1 %vm1048_vm1, %v1403_v45 }
 0x8d6   : > { %v1086_v51 = vpop.f32.mrb[4].mxu1 }
 0x8d7   : > { %v1105_v52 = vmul.f32 %v1098_v47, %v1086_v51  ;;  %v1333_v53 = vpop.f32.mrb[5].mxu1 }
 0x8d8   : > { %v1089_v54 = vpop.f32.mrb[6].mxu1 }
 0x8d9   : > { %v1119_v55 = vadd.f32 %v1112_v50, %v1105_v52  ;;  %v1106_v33 = vmul.f32 %v1103_v48, %v1089_v54  ;;  %v1334_v56 = vpop.f32.mrb[7].mxu1 }
 0x8db   : > { %v1121_v14 = vmax.f32 %v1119_v55, 0.0  ;;  %v1120_v38 = vadd.f32 %v1117_v57, %v1106_v33 }
 0x8dd   : > { %1123 = vst.msk [vmem:[%s489_s14] sm:$0xff] %vm1048_vm1, %v1121_v14  ;;  %v1122_v46 = vmax.f32 %v1120_v38, 0.0 }
 0x8df   : > { %1124 = vst.msk [vmem:[%s489_s14 + $0x8] sm:$0xff] %vm1048_vm1, %v1122_v46 }
 0x8e0   : > { %1445 = shalt.err (!%p1442_p5)
}
 0x8e1   : > { %s1446_s29 = scalar_lea.hbm %s1821_s17, 256  ;;  %s1450_s0 = scalar_lea.hbm %s1885_s12, 512 }
 0x8e2   : > { %p1447_p6 = scmp.ne.s32.totalorder %s1821_s17, %s1446_s29  ;;  %p1451_p10 = scmp.lt.u32.totalorder %s1821_s17, %s1885_s12 }
 0x8e3   : > { %p1452_p11 = scmp.lt.u32.totalorder %s1450_s0, %s1446_s29  ;;  %p1454_p13 = scmp.lt.u32.totalorder %s1446_s29, %s1821_s17 }
 0x8e4   : > { %p1448_p7 = pnand %p1447_p6, %p1623_p4 }
 0x8e5   : > { %p1453_p12 = por %p1452_p11, %p1451_p10 }
 0x8e6   : > { %p1449_p9 = pneg %p1448_p7 }
 0x8e7   : > { %p1455_p0 = por %p1454_p13, %p1453_p12 }
 0x8e9   : > { %p1456_p1 = pnand %p1455_p0, %p1449_p9 }
 0x8eb   : > { %1459 = shalt.err (!%p1456_p1)
}
 0x8ec   : > { %s1516_s18 = smov 128   ;;  %s1517_s28 = smov 8  }
 0x8ed   : > { %1339 = dma.vmem_to_hbm [thread:$0]  (%p1623_p4), %s1823_s20, 256, %s1821_s17, %s1827_s24, %s1516_s18, %s1516_s18, %s1517_s28  }
 0x8ee PF: > { %p1345_p2 = scmp.ge.s32.totalorder %s1510_s26, 2  ;;  %s1155_s19 = sand.u32 1, %s1490_s21  }
 0x8ef   : > { %s1156_s29 = scalar_lea.sflag [#allocation3], %s1155_s19 }
 0x8f0   : > { %p1342_p3 = pnand %p1345_p2, %p1630_p8 }
 0x8f2   : > { %1485 = dma.done.wait (!%p1342_p3), %s1156_s29, 256  }
 0x8f3   : > { %1487 = vsyncadd (!%p1342_p3), %s1156_s29, 4294967040  ;;  %s25_s26 = sadd.s32 1, %s1510_s26   ;;  %s1894_s13 = sld [smem:[#allocation5_spill]] }
 0x8f4   : > { %p22_p5 = scmp.ge.s32.totalorder %s25_s26, 4   ;;  %s1895_s21 = smov %s1494_s22 }
 0x8f5   : > { %s1896_s22 = smov %s1498_s23  ;;  %s1897_s23 = smov %s1636_s16 }
 0x8f6   : > { %s1898_s24 = smov %s1506_s25  ;;  %24 = sbr.rel (!%p22_p5) target bundleno = 7 (0x7), region = 115 }
 0x8f9   : > { %s1899_s25 = smov %s1894_s13 }
 0x8fd   :  { %1161 = vsyncpa [#allocation3], 1 }
 0x8fe   :  { %1163 = vsyncpa [#allocation3 + $0x1], 1 }

</bundles_post_ra>
